<compile_context>
chip_gen: v6e
topology: v6e:2x2x1
jax: 0.10.0
libtpu: 0.0.40
codegen_flags: <defaults>
</compile_context>

<pallas_src>
import functools

import jax
import jax.numpy as jnp
from jax import lax
from jax.experimental import pallas as pl
from jax.experimental.pallas import tpu as pltpu  # noqa: F401  (TPU backend)

LEAKY_SLOPE = 0.2   # GraphLayer default negative_slope
BN_EPS = 1e-5
NEG_BIG = -1e30


# ----------------------------------------------------------------------------
# Single fused kernel: GNN attention layer + BN/ReLU/scale/BN/ReLU + OutLayer
# ----------------------------------------------------------------------------
def _gdn_fused_kernel(B, N,
                      x_ref, w_ref, pd_ref, pn_ref, amask_ref, emb_ref,
                      out_ref):
    # ---- packed small parameters (single (8, D) and (3, N) DMA) ------------
    att_i = pd_ref[0:1, :]        # (1, D)
    att_j = pd_ref[1:2, :]
    gnn_bias = pd_ref[2:3, :]
    g1 = pd_ref[3:4, :]
    b1 = pd_ref[4:5, :]
    g2 = pd_ref[5:6, :]
    b2 = pd_ref[6:7, :]
    w_out = pd_ref[7:8, :]

    semb = pn_ref[0:1, :]         # (1, N)  emb . att_em_i   (batch-invariant)
    temb = pn_ref[1:2, :]         # (1, N)  emb . att_em_j
    b_out = pn_ref[2:3, 0:1]      # (1, 1)

    # ---- GraphLayer linear: one (B*N, F) x (F, D) MXU matmul ---------------
    g_flat = jnp.dot(x_ref[...], w_ref[...],
                     preferred_element_type=jnp.float32)            # (B*N, D)
    D = g_flat.shape[-1]
    g = g_flat.reshape(B, N, D)                                     # (B, N, D)

    # ---- attention logits: VPU mul + lane reduce (no rank-1 matmuls) -------
    s = jnp.sum(g * att_i[None], axis=-1) + semb                    # (B, N)
    t = jnp.sum(g * att_j[None], axis=-1) + temb                    # (B, N)
    score = s[:, :, None] + t[:, None, :]                           # (B, N, N)
    # leaky_relu (valid since 0 < slope < 1): one max instead of cmp+select
    score = jnp.maximum(score, LEAKY_SLOPE * score)
    # additive mask (0 where edge, -1e30 where not): one add instead of where
    logits = score + amask_ref[...][None]

    # ---- softmax over neighbors (self-loop guarantees a finite max) --------
    m = jnp.max(logits, axis=-1, keepdims=True)
    p = jnp.exp(logits - m)            # masked entries underflow to exactly 0
    alpha = p * pl.reciprocal(jnp.sum(p, axis=-1, keepdims=True), approx=True)

    # ---- aggregate:  out_i = sum_j alpha_ij * g_j  (+ bias) ----------------
    agg = jnp.einsum("bij,bjd->bid", alpha, g,
                     preferred_element_type=jnp.float32)            # (B, N, D)
    h = agg.reshape(B * N, D) + gnn_bias                            # (B*N, D)

    inv_cnt = jnp.float32(1.0 / (B * N))

    # ---- GNNLayer.bn: BatchNorm1d (training stats, one-pass) + ReLU --------
    mean1 = jnp.sum(h, axis=0, keepdims=True) * inv_cnt
    var1 = jnp.maximum(
        jnp.sum(h * h, axis=0, keepdims=True) * inv_cnt - mean1 * mean1, 0.0)
    h = (h - mean1) * lax.rsqrt(var1 + BN_EPS) * g1 + b1
    h = jnp.maximum(h, 0.0)

    # ---- torch.mul(x, embedding): broadcast (N, D) over batch --------------
    h = (h.reshape(B, N, D) * emb_ref[...][None]).reshape(B * N, D)

    # ---- bn_outlayer_in (per-channel, one-pass stats) + ReLU ---------------
    mean2 = jnp.sum(h, axis=0, keepdims=True) * inv_cnt
    var2 = jnp.maximum(
        jnp.sum(h * h, axis=0, keepdims=True) * inv_cnt - mean2 * mean2, 0.0)
    h = (h - mean2) * lax.rsqrt(var2 + BN_EPS) * g2 + b2
    h = jnp.maximum(h, 0.0)

    # TODO(synk): nn.Dropout(0.2) treated as identity (eval semantics);
    #             train-mode RNG masking is not reproduced.

    # ---- OutLayer (out_layer_num=1 == Linear(D, 1)); lane-dense (1, B*N) ---
    dn = (((1,), (1,)), ((), ()))          # contract last dims: (1,D)x(B*N,D)^T
    y = lax.dot_general(w_out, h, dn,
                        preferred_element_type=jnp.float32)         # (1, B*N)
    out_ref[...] = y + b_out


def gdn_fused_pallas(B, N, x_flat, w_lin, pack_d, pack_n, addmask, emb):
    # Everything fits trivially in VMEM at these sizes (few KiB), so a single
    # gridless call keeps the intermediate resident and pays one launch cost.
    kernel = functools.partial(_gdn_fused_kernel, B, N)
    y = pl.pallas_call(
        kernel,
        out_shape=jax.ShapeDtypeStruct((1, B * N), jnp.float32),
    )(x_flat, w_lin, pack_d, pack_n, addmask, emb)
    return y.reshape(B, N)


# ----------------------------------------------------------------------------
# Full GDN forward (plain-JAX glue: learned-graph top-k + hoisted terms)
# ----------------------------------------------------------------------------
def gdn_forward(params, data):
    B, N, F = data.shape
    emb = params["embedding"]                                # (N, D)
    D = emb.shape[-1]

    # learned graph: top-k over cosine similarity
    norms = jnp.linalg.norm(emb, axis=-1)
    cos = (emb @ emb.T) / (norms[:, None] * norms[None, :])
    topk_idx = lax.top_k(cos, params["topk"])[1]             # (N, topk)
    mask = jnp.zeros((N, N), jnp.float32).at[
        jnp.arange(N)[:, None], topk_idx].set(1.0)
    # remove_self_loops + add_self_loops  ->  neighbors = topk U {self}
    mask = jnp.maximum(mask, jnp.eye(N, dtype=jnp.float32))
    # additive mask: 0 where edge, -1e30 elsewhere
    addmask = jnp.where(mask > 0, jnp.float32(0.0), jnp.float32(NEG_BIG))

    # hoisted batch-invariant attention terms (computed once, not per batch)
    semb = jnp.dot(emb, params["att_em_i"]).reshape(1, N)    # emb . att_em_i
    temb = jnp.dot(emb, params["att_em_j"]).reshape(1, N)    # emb . att_em_j

    # packed small parameters: one (8, D) and one (3, N) DMA instead of ~13
    pack_d = jnp.stack([
        params["att_i"], params["att_j"], params["gnn_bias"],
        params["bn1_gamma"], params["bn1_beta"],
        params["bn2_gamma"], params["bn2_beta"], params["w_out"],
    ], axis=0).astype(jnp.float32)                           # (8, D)
    pack_n = jnp.concatenate([
        semb, temb, jnp.full((1, N), params["b_out"][0], jnp.float32),
    ], axis=0).astype(jnp.float32)                           # (3, N)

    x_flat = data.reshape(B * N, F)

    return gdn_fused_pallas(B, N, x_flat, params["w_lin"],
                            pack_d, pack_n, addmask, emb)


# ----------------------------------------------------------------------------
# Pure-JAX reference (same math, HIGHEST-precision matmuls) for validation
# ----------------------------------------------------------------------------
def reference_forward(params, data):
    hp = lax.Precision.HIGHEST
    B, N, F = data.shape
    emb = params["embedding"]
    norms = jnp.linalg.norm(emb, axis=-1)
    cos = (emb @ emb.T) / (norms[:, None] * norms[None, :])
    topk_idx = lax.top_k(cos, params["topk"])[1]
    mask = jnp.zeros((N, N), jnp.float32).at[
        jnp.arange(N)[:, None], topk_idx].set(1.0)
    mask = jnp.maximum(mask, jnp.eye(N, dtype=jnp.float32))

    g = jnp.einsum("bnf,fd->bnd", data, params["w_lin"], precision=hp)
    s = (jnp.einsum("bnd,d->bn", g, params["att_i"], precision=hp)
         + jnp.dot(emb, params["att_em_i"], precision=hp)[None])
    t = (jnp.einsum("bnd,d->bn", g, params["att_j"], precision=hp)
         + jnp.dot(emb, params["att_em_j"], precision=hp)[None])
    score = s[:, :, None] + t[:, None, :]
    score = jnp.where(score > 0, score, LEAKY_SLOPE * score)
    logits = jnp.where(mask[None] > 0, score, -1e30)
    m = jnp.max(logits, axis=-1, keepdims=True)
    p = jnp.exp(logits - m) * mask[None]
    alpha = p / jnp.sum(p, axis=-1, keepdims=True)
    out = jnp.einsum("bij,bjd->bid", alpha, g, precision=hp) + params["gnn_bias"]

    def bn(x, gamma, beta):
        mean = jnp.mean(x, axis=(0, 1), keepdims=True)
        var = jnp.mean((x - mean) ** 2, axis=(0, 1), keepdims=True)
        return (x - mean) * lax.rsqrt(var + BN_EPS) * gamma + beta

    out = jnp.maximum(bn(out, params["bn1_gamma"], params["bn1_beta"]), 0.0)
    out = out * emb[None]
    out = jnp.maximum(bn(out, params["bn2_gamma"], params["bn2_beta"]), 0.0)
    y = jnp.einsum("bnd,d->bn", out, params["w_out"], precision=hp) + params["b_out"]
    return y


# ----------------------------------------------------------------------------
if __name__ == "__main__":
    # small, self-consistent shapes
    BATCH, NODE_NUM, INPUT_DIM, DIM, TOPK = 2, 16, 8, 32, 5

    key = jax.random.PRNGKey(0)
    ks = jax.random.split(key, 12)

    be = 1.0 / jnp.sqrt(DIM)        # kaiming_uniform(a=sqrt(5)) bound for embedding
    bl = 1.0 / jnp.sqrt(INPUT_DIM)  # Linear init bound

    params = {
        "topk": TOPK,
        "embedding": jax.random.uniform(ks[0], (NODE_NUM, DIM), jnp.float32, -be, be),
        "w_lin":     jax.random.uniform(ks[1], (INPUT_DIM, DIM), jnp.float32, -bl, bl),
        "att_i":     jax.random.uniform(ks[2], (DIM,), jnp.float32, -be, be),
        "att_j":     jax.random.uniform(ks[3], (DIM,), jnp.float32, -be, be),
        "att_em_i":  jax.random.uniform(ks[4], (DIM,), jnp.float32, -be, be),
        "att_em_j":  jax.random.uniform(ks[5], (DIM,), jnp.float32, -be, be),
        "gnn_bias":  jax.random.uniform(ks[6], (DIM,), jnp.float32, -0.1, 0.1),
        "bn1_gamma": jax.random.uniform(ks[7], (DIM,), jnp.float32, 0.5, 1.5),
        "bn1_beta":  jax.random.uniform(ks[8], (DIM,), jnp.float32, -0.1, 0.1),
        "bn2_gamma": jax.random.uniform(ks[9], (DIM,), jnp.float32, 0.5, 1.5),
        "bn2_beta":  jax.random.uniform(ks[10], (DIM,), jnp.float32, -0.1, 0.1),
        "w_out":     jax.random.uniform(ks[11], (DIM,), jnp.float32, -be, be),
        "b_out":     jnp.float32(0.05) * jnp.ones((1,), jnp.float32),
    }

    data = jax.random.uniform(jax.random.PRNGKey(42),
                              (BATCH, NODE_NUM, INPUT_DIM), jnp.float32, -1.0, 1.0)

    out = gdn_forward(params, data)
    out = jax.block_until_ready(out)

    ref = jax.block_until_ready(reference_forward(params, data))
    assert out.shape == (BATCH, NODE_NUM), out.shape
    assert jnp.allclose(out, ref, atol=1e-2, rtol=1e-2), (
        f"max abs diff {jnp.max(jnp.abs(out - ref))}")

    print("KERNEL_OK")
</pallas_src>

<mosaic_0001>
module attributes {stable_mosaic.version = 11 : i64} {
  func.func @_gdn_fused_kernel(%arg0: memref<32x8xf32, #tpu.memory_space<vmem>>, %arg1: memref<8x32xf32, #tpu.memory_space<vmem>>, %arg2: memref<8x32xf32, #tpu.memory_space<vmem>>, %arg3: memref<3x16xf32, #tpu.memory_space<vmem>>, %arg4: memref<16x16xf32, #tpu.memory_space<vmem>>, %arg5: memref<16x32xf32, #tpu.memory_space<vmem>>, %arg6: memref<1x32xf32, #tpu.memory_space<vmem>>) attributes {dimension_semantics = [], scalar_prefetch = 0 : i64, scratch_operands = 0 : i64, tpu.core_type = #tpu.core_type<tc>} {
    %c0 = arith.constant 0 : index
    %c0_0 = arith.constant 0 : index
    %0 = vector.load %arg2[%c0, %c0_0] : memref<8x32xf32, #tpu.memory_space<vmem>>, vector<1x32xf32>
    %c1 = arith.constant 1 : index
    %c0_1 = arith.constant 0 : index
    %1 = vector.load %arg2[%c1, %c0_1] : memref<8x32xf32, #tpu.memory_space<vmem>>, vector<1x32xf32>
    %c2 = arith.constant 2 : index
    %c0_2 = arith.constant 0 : index
    %2 = vector.load %arg2[%c2, %c0_2] : memref<8x32xf32, #tpu.memory_space<vmem>>, vector<1x32xf32>
    %c3 = arith.constant 3 : index
    %c0_3 = arith.constant 0 : index
    %3 = vector.load %arg2[%c3, %c0_3] : memref<8x32xf32, #tpu.memory_space<vmem>>, vector<1x32xf32>
    %c4 = arith.constant 4 : index
    %c0_4 = arith.constant 0 : index
    %4 = vector.load %arg2[%c4, %c0_4] : memref<8x32xf32, #tpu.memory_space<vmem>>, vector<1x32xf32>
    %c5 = arith.constant 5 : index
    %c0_5 = arith.constant 0 : index
    %5 = vector.load %arg2[%c5, %c0_5] : memref<8x32xf32, #tpu.memory_space<vmem>>, vector<1x32xf32>
    %c6 = arith.constant 6 : index
    %c0_6 = arith.constant 0 : index
    %6 = vector.load %arg2[%c6, %c0_6] : memref<8x32xf32, #tpu.memory_space<vmem>>, vector<1x32xf32>
    %c7 = arith.constant 7 : index
    %c0_7 = arith.constant 0 : index
    %7 = vector.load %arg2[%c7, %c0_7] : memref<8x32xf32, #tpu.memory_space<vmem>>, vector<1x32xf32>
    %c0_8 = arith.constant 0 : index
    %c0_9 = arith.constant 0 : index
    %8 = vector.load %arg3[%c0_8, %c0_9] : memref<3x16xf32, #tpu.memory_space<vmem>>, vector<1x16xf32>
    %c1_10 = arith.constant 1 : index
    %c0_11 = arith.constant 0 : index
    %9 = vector.load %arg3[%c1_10, %c0_11] : memref<3x16xf32, #tpu.memory_space<vmem>>, vector<1x16xf32>
    %c2_12 = arith.constant 2 : index
    %c0_13 = arith.constant 0 : index
    %10 = vector.load %arg3[%c2_12, %c0_13] : memref<3x16xf32, #tpu.memory_space<vmem>>, vector<1x1xf32>
    %c0_14 = arith.constant 0 : index
    %c0_15 = arith.constant 0 : index
    %11 = vector.load %arg0[%c0_14, %c0_15] : memref<32x8xf32, #tpu.memory_space<vmem>>, vector<32x8xf32>
    %c0_16 = arith.constant 0 : index
    %c0_17 = arith.constant 0 : index
    %12 = vector.load %arg1[%c0_16, %c0_17] : memref<8x32xf32, #tpu.memory_space<vmem>>, vector<8x32xf32>
    %cst = arith.constant dense<0.000000e+00> : vector<32x32xf32>
    %13 = tpu.matmul %11, %12, %cst {dimension_numbers = #tpu.dot_dimension_numbers<[1], [0], [0], [1], [0, 0, 1, 1], [], []>} : vector<32x8xf32>, vector<8x32xf32>, vector<32x32xf32> -> vector<32x32xf32>
    %14 = vector.shape_cast %13 : vector<32x32xf32> to vector<2x16x32xf32>
    %15 = vector.shape_cast %0 : vector<1x32xf32> to vector<1x1x32xf32>
    %16 = vector.broadcast %15 : vector<1x1x32xf32> to vector<2x16x32xf32>
    %17 = arith.mulf %14, %16 : vector<2x16x32xf32>
    %cst_18 = arith.constant dense<0.000000e+00> : vector<2x16xf32>
    %18 = vector.multi_reduction <add>, %17, %cst_18 [2] : vector<2x16x32xf32> to vector<2x16xf32>
    %19 = vector.broadcast %8 : vector<1x16xf32> to vector<2x16xf32>
    %20 = arith.addf %18, %19 : vector<2x16xf32>
    %21 = vector.shape_cast %1 : vector<1x32xf32> to vector<1x1x32xf32>
    %22 = vector.broadcast %21 : vector<1x1x32xf32> to vector<2x16x32xf32>
    %23 = arith.mulf %14, %22 : vector<2x16x32xf32>
    %cst_19 = arith.constant dense<0.000000e+00> : vector<2x16xf32>
    %24 = vector.multi_reduction <add>, %23, %cst_19 [2] : vector<2x16x32xf32> to vector<2x16xf32>
    %25 = vector.broadcast %9 : vector<1x16xf32> to vector<2x16xf32>
    %26 = arith.addf %24, %25 : vector<2x16xf32>
    %27 = vector.shape_cast %20 : vector<2x16xf32> to vector<2x16x1xf32>
    %28 = vector.shape_cast %26 : vector<2x16xf32> to vector<2x1x16xf32>
    %29 = vector.broadcast %27 : vector<2x16x1xf32> to vector<2x16x16xf32>
    %30 = vector.broadcast %28 : vector<2x1x16xf32> to vector<2x16x16xf32>
    %31 = arith.addf %29, %30 : vector<2x16x16xf32>
    %cst_20 = arith.constant 2.000000e-01 : f32
    %32 = vector.broadcast %cst_20 : f32 to vector<2x16x16xf32>
    %33 = arith.mulf %32, %31 : vector<2x16x16xf32>
    %34 = arith.maximumf %31, %33 : vector<2x16x16xf32>
    %c0_21 = arith.constant 0 : index
    %c0_22 = arith.constant 0 : index
    %35 = vector.load %arg4[%c0_21, %c0_22] : memref<16x16xf32, #tpu.memory_space<vmem>>, vector<16x16xf32>
    %36 = vector.shape_cast %35 : vector<16x16xf32> to vector<1x16x16xf32>
    %37 = vector.broadcast %36 : vector<1x16x16xf32> to vector<2x16x16xf32>
    %38 = arith.addf %34, %37 : vector<2x16x16xf32>
    %cst_23 = arith.constant dense<0xFF800000> : vector<2x16xf32>
    %39 = vector.multi_reduction <maximumf>, %38, %cst_23 [2] : vector<2x16x16xf32> to vector<2x16xf32>
    %40 = vector.shape_cast %39 : vector<2x16xf32> to vector<2x16x1xf32>
    %41 = vector.broadcast %40 : vector<2x16x1xf32> to vector<2x16x16xf32>
    %42 = arith.subf %38, %41 : vector<2x16x16xf32>
    %43 = math.exp %42 : vector<2x16x16xf32>
    %cst_24 = arith.constant dense<0.000000e+00> : vector<2x16xf32>
    %44 = vector.multi_reduction <add>, %43, %cst_24 [2] : vector<2x16x16xf32> to vector<2x16xf32>
    %45 = vector.shape_cast %44 : vector<2x16xf32> to vector<2x16x1xf32>
    %46 = tpu.reciprocal %45 {approx = true} : vector<2x16x1xf32> -> vector<2x16x1xf32>
    %47 = vector.broadcast %46 : vector<2x16x1xf32> to vector<2x16x16xf32>
    %48 = arith.mulf %43, %47 : vector<2x16x16xf32>
    "tpu.trace_start"() <{level = 10 : i32, message = "bij,bjd->bid"}> : () -> ()
    %cst_25 = arith.constant dense<0.000000e+00> : vector<2x16x32xf32>
    %49 = tpu.matmul %48, %14, %cst_25 {dimension_numbers = #tpu.dot_dimension_numbers<[2], [1], [1], [2], [0, 0, 0, 1, 1, 2], [0], [0]>} : vector<2x16x16xf32>, vector<2x16x32xf32>, vector<2x16x32xf32> -> vector<2x16x32xf32>
    "tpu.trace_stop"() : () -> ()
    %50 = vector.shape_cast %49 : vector<2x16x32xf32> to vector<32x32xf32>
    %51 = vector.broadcast %2 : vector<1x32xf32> to vector<32x32xf32>
    %52 = arith.addf %50, %51 : vector<32x32xf32>
    %cst_26 = arith.constant dense<0.000000e+00> : vector<32xf32>
    %53 = vector.multi_reduction <add>, %52, %cst_26 [0] : vector<32x32xf32> to vector<32xf32>
    %54 = vector.shape_cast %53 : vector<32xf32> to vector<1x32xf32>
    %cst_27 = arith.constant 3.125000e-02 : f32
    %55 = vector.broadcast %cst_27 : f32 to vector<1x32xf32>
    %56 = arith.mulf %54, %55 : vector<1x32xf32>
    %57 = arith.mulf %52, %52 : vector<32x32xf32>
    %cst_28 = arith.constant dense<0.000000e+00> : vector<32xf32>
    %58 = vector.multi_reduction <add>, %57, %cst_28 [0] : vector<32x32xf32> to vector<32xf32>
    %59 = vector.shape_cast %58 : vector<32xf32> to vector<1x32xf32>
    %cst_29 = arith.constant 3.125000e-02 : f32
    %60 = vector.broadcast %cst_29 : f32 to vector<1x32xf32>
    %61 = arith.mulf %59, %60 : vector<1x32xf32>
    %62 = arith.mulf %56, %56 : vector<1x32xf32>
    %63 = arith.subf %61, %62 : vector<1x32xf32>
    %cst_30 = arith.constant 0.000000e+00 : f32
    %64 = vector.broadcast %cst_30 : f32 to vector<1x32xf32>
    %65 = arith.maximumf %63, %64 : vector<1x32xf32>
    %66 = vector.broadcast %56 : vector<1x32xf32> to vector<32x32xf32>
    %67 = arith.subf %52, %66 : vector<32x32xf32>
    %cst_31 = arith.constant 9.99999974E-6 : f32
    %68 = vector.broadcast %cst_31 : f32 to vector<1x32xf32>
    %69 = arith.addf %65, %68 : vector<1x32xf32>
    %70 = math.rsqrt %69 : vector<1x32xf32>
    %71 = vector.broadcast %70 : vector<1x32xf32> to vector<32x32xf32>
    %72 = arith.mulf %67, %71 : vector<32x32xf32>
    %73 = vector.broadcast %3 : vector<1x32xf32> to vector<32x32xf32>
    %74 = arith.mulf %72, %73 : vector<32x32xf32>
    %75 = vector.broadcast %4 : vector<1x32xf32> to vector<32x32xf32>
    %76 = arith.addf %74, %75 : vector<32x32xf32>
    %cst_32 = arith.constant 0.000000e+00 : f32
    %77 = vector.broadcast %cst_32 : f32 to vector<32x32xf32>
    %78 = arith.maximumf %76, %77 : vector<32x32xf32>
    %79 = vector.shape_cast %78 : vector<32x32xf32> to vector<2x16x32xf32>
    %c0_33 = arith.constant 0 : index
    %c0_34 = arith.constant 0 : index
    %80 = vector.load %arg5[%c0_33, %c0_34] : memref<16x32xf32, #tpu.memory_space<vmem>>, vector<16x32xf32>
    %81 = vector.shape_cast %80 : vector<16x32xf32> to vector<1x16x32xf32>
    %82 = vector.broadcast %81 : vector<1x16x32xf32> to vector<2x16x32xf32>
    %83 = arith.mulf %79, %82 : vector<2x16x32xf32>
    %84 = vector.shape_cast %83 : vector<2x16x32xf32> to vector<32x32xf32>
    %cst_35 = arith.constant dense<0.000000e+00> : vector<32xf32>
    %85 = vector.multi_reduction <add>, %84, %cst_35 [0] : vector<32x32xf32> to vector<32xf32>
    %86 = vector.shape_cast %85 : vector<32xf32> to vector<1x32xf32>
    %cst_36 = arith.constant 3.125000e-02 : f32
    %87 = vector.broadcast %cst_36 : f32 to vector<1x32xf32>
    %88 = arith.mulf %86, %87 : vector<1x32xf32>
    %89 = arith.mulf %84, %84 : vector<32x32xf32>
    %cst_37 = arith.constant dense<0.000000e+00> : vector<32xf32>
    %90 = vector.multi_reduction <add>, %89, %cst_37 [0] : vector<32x32xf32> to vector<32xf32>
    %91 = vector.shape_cast %90 : vector<32xf32> to vector<1x32xf32>
    %cst_38 = arith.constant 3.125000e-02 : f32
    %92 = vector.broadcast %cst_38 : f32 to vector<1x32xf32>
    %93 = arith.mulf %91, %92 : vector<1x32xf32>
    %94 = arith.mulf %88, %88 : vector<1x32xf32>
    %95 = arith.subf %93, %94 : vector<1x32xf32>
    %cst_39 = arith.constant 0.000000e+00 : f32
    %96 = vector.broadcast %cst_39 : f32 to vector<1x32xf32>
    %97 = arith.maximumf %95, %96 : vector<1x32xf32>
    %98 = vector.broadcast %88 : vector<1x32xf32> to vector<32x32xf32>
    %99 = arith.subf %84, %98 : vector<32x32xf32>
    %cst_40 = arith.constant 9.99999974E-6 : f32
    %100 = vector.broadcast %cst_40 : f32 to vector<1x32xf32>
    %101 = arith.addf %97, %100 : vector<1x32xf32>
    %102 = math.rsqrt %101 : vector<1x32xf32>
    %103 = vector.broadcast %102 : vector<1x32xf32> to vector<32x32xf32>
    %104 = arith.mulf %99, %103 : vector<32x32xf32>
    %105 = vector.broadcast %5 : vector<1x32xf32> to vector<32x32xf32>
    %106 = arith.mulf %104, %105 : vector<32x32xf32>
    %107 = vector.broadcast %6 : vector<1x32xf32> to vector<32x32xf32>
    %108 = arith.addf %106, %107 : vector<32x32xf32>
    %cst_41 = arith.constant 0.000000e+00 : f32
    %109 = vector.broadcast %cst_41 : f32 to vector<32x32xf32>
    %110 = arith.maximumf %108, %109 : vector<32x32xf32>
    %cst_42 = arith.constant dense<0.000000e+00> : vector<1x32xf32>
    %111 = tpu.matmul %7, %110, %cst_42 {dimension_numbers = #tpu.dot_dimension_numbers<[1], [1], [0], [0], [0, 0, 1, 0], [], []>} : vector<1x32xf32>, vector<32x32xf32>, vector<1x32xf32> -> vector<1x32xf32>
    %112 = vector.broadcast %10 : vector<1x1xf32> to vector<1x32xf32>
    %113 = arith.addf %111, %112 : vector<1x32xf32>
    %c0_43 = arith.constant 0 : index
    %c0_44 = arith.constant 0 : index
    %114 = vector.load %arg6[%c0_43, %c0_44] : memref<1x32xf32, #tpu.memory_space<vmem>>, vector<1x32xf32>
    tpu.vector_store %arg6[%c0_43, %c0_44], %113 {strides = array<i32>} : memref<1x32xf32, #tpu.memory_space<vmem>>, vector<1x32xf32>,
    return
  }
}

</mosaic_0001>

<bundles_post_ra>
// kernel: tpu_custom_call.1
= control target key start
LH: loop header
LB: loop body
LE: loop exit
PB: predicated region body
PF: predicated region fallthrough
CT: control target
= control target key end

     0   :  { %11 = vsyncpa [#allocation3], 0  ;;  %s1065_s0 = inlined_call_operand.vmem [shape: f32[32,8], index: 0, kind: input, shape index: {}]   ;;  %s1066_s1 = inlined_call_operand.vmem [shape: f32[8,32], index: 1, kind: input, shape index: {}]   ;;  %s1067_s2 = inlined_call_operand.hbm [shape: f32[8,32], index: 2, kind: input, shape index: {}]   ;;  %s1068_s3 = inlined_call_operand.vmem [shape: f32[3,16], index: 3, kind: input, shape index: {}]   ;;  %s1069_s4 = inlined_call_operand.vmem [shape: f32[16,16], index: 4, kind: input, shape index: {}]   ;;  %s1070_s5 = inlined_call_operand.vmem [shape: f32[16,32], index: 5, kind: input, shape index: {}]   ;;  %s1071_s6 = inlined_call_operand.hbm [shape: f32[1,32], index: 6, kind: output, shape index: {}]  }
   0x1   :  { %12 = vsyncpa [#allocation4], 0  ;;  %s925_s21 = smov [#allocation2]  }
   0x2   :  { %s23_s22 = sshll.u32 %s925_s21, 4  ;;  %s24_s22 = int_to_ptr.vmem [resolvable:$true] %s23_s22 }
   0x3   :  { %s889_s23 = scalar_lea.vmem %s24_s22, 128  ;;  %p894_p1 = scmp.lt.s32.totalorder %s24_s22, %s24_s22 }
   0x4   :  { %p890_p0 = scmp.ne.s32.totalorder %s24_s22, %s889_s23  ;;  %p895_p2 = scmp.lt.s32.totalorder %s889_s23, %s889_s23 }
   0x6   :  { %p896_p3 = por %p895_p2, %p894_p1 }
   0x8   :  { %p897_p4 = pnand %p896_p3, %p890_p0 }
   0xa   :  { %900 = shalt.err (!%p897_p4)
}
   0xb   :  { %26 = dma.hbm_to_vmem [thread:$0]  %s1067_s2, 128, %s24_s22, [#allocation3]  }
   0xc   :  { %921 = dma.done.wait [#allocation3], 128  }
   0xd   :  { %922 = vsyncadd [#allocation3], 4294967168  ;;  %vm52_vm0 = vcmask 64512   ;;  %v51_v0 = vld [vmem:[%s1066_s1] sm:$0xff]  ;;  %v48_v2 = vld [vmem:[%s1065_s0 + $0x8] sm:$0xff]  ;;  %vm158_vm1 = vcmask 261120   ;;  %v263_v50 = vlaneseq }
   0xe   :  { %v47_v1 = vld [vmem:[%s1065_s0] sm:$0xff]  ;;  %821 = vmatprep.subr.mxu1 %v51_v0  ;;  %v49_v3 = vld [vmem:[%s1065_s0 + $0x10] sm:$0xff]  ;;  %v50_v4 = vld [vmem:[%s1065_s0 + $0x18] sm:$0xff]  ;;  %v926_v28 = vmov 0   ;;  %vm274_vm2 = vcmask 130112   ;;  %vm323_vm3 = vcmask 130048  }
   0xf   :  { %823 = vmatprep.mubr.msk.f32.mxu1 %vm52_vm0, %v47_v1  ;;  %822 = vmatpush3.msra.mxu1 %v51_v0  ;;  %v787_v5 = vld [vmem:[#allocation2 + $0x1] ss:$0 sm:$0xff]  ;;  %v785_v6 = vld [vmem:[#allocation2] ss:$0 sm:$0xff]  ;;  %v264_v51 = vand.u32 127, %v263_v50  ;;  %v266_v53 = vshrl.u32 %v263_v50, 7 }
  0x10   :  { %824 = vmatmul.mubr.msk.f32.vlgmr.msra.gmra.mxu1 %vm52_vm0, %v48_v2  ;;  %v788_v27 = vld [vmem:[%s1068_s3 + $0x1] ss:$0 sm:$0xff]  ;;  %859 = vset.pattern.permute.xlu1 %v926_v28  ;;  %v786_v29 = vld [vmem:[%s1068_s3] ss:$0 sm:$0xff]  ;;  %v46_v50 = vld [vmem:[%s1068_s3 + $0x2] sm:$0x1] }
  0x11   :  { %826 = vmatprep.mubr.msk.f32.mxu1 %vm52_vm0, %v49_v3  ;;  %860 = vset.pattern.permute.xlu0 %v926_v28  ;;  %v269_v54 = vadd.s32 4294967288, %v264_v51  ;;  %v267_v58 = vsub.s32 %v264_v51, %v266_v53  ;;  %vm928_vm4 = vmmov 0   ;;  %vm764_vm5 = vcmask 253952  }
  0x13   :  { %v272_v57 = vsub.s32 %v269_v54, %v266_v53 }
  0x14   :  { %827 = vmatmul.mubr.msk.f32.gmra.mxu1 %vm52_vm0, %v50_v4 }
  0xd0   :  { %v825_v7 = vpop.f32.mrf.mxu1 }
  0xd1   :  { %829 = vmatprep.subr.mxu1 %v825_v7  ;;  %v194_v8 = vmul.f32 %v825_v7, %v787_v5  ;;  %v155_v9 = vmul.f32 %v825_v7, %v785_v6 }
  0xd2   :  { %v131_v10 = vpop.f32.mrf.mxu1  ;;  %830 = vmatpush3.msra.mxu1 %v825_v7 }
  0xd3   :  { %831 = vmatprep.subr.mxu1 %v131_v10  ;;  %v200_v11 = vsel %vm158_vm1, %v194_v8, 0.0  ;;  %v162_v12 = vsel %vm158_vm1, %v155_v9, 0.0  ;;  %v193_v13 = vmul.f32 %v787_v5, %v131_v10  ;;  %v154_v15 = vmul.f32 %v785_v6, %v131_v10  ;;  %v318_v9 = vld [vmem:[%s1069_s4 + $0x8] sm:$0xff] }
  0xd4   :  { %832 = vmatpush3.msra.mxu1 %v131_v10  ;;  %201 = vadd.xlane.f32.xlu0 %v200_v11  ;;  %v985_v14 = vpop.f32.mrf.mxu1  ;;  %v317_v10 = vld [vmem:[%s1069_s4] sm:$0xff] }
  0xd5   :  { %163 = vadd.xlane.f32.xlu1 %v162_v12  ;;  %836 = vmatprep.subr.mxu1 %v985_v14  ;;  %v196_v17 = vmul.f32 %v985_v14, %v787_v5  ;;  %v197_v18 = vsel %vm158_vm1, %v193_v13, 0.0  ;;  %v159_v20 = vsel %vm158_vm1, %v154_v15, 0.0  ;;  %v157_v24 = vmul.f32 %v985_v14, %v785_v6 }
  0xd6   :  { %v988_v16 = vpop.f32.mrf.mxu1 }
  0xd7   :  { %v195_v19 = vmul.f32 %v787_v5, %v988_v16  ;;  %v206_v22 = vsel %vm158_vm1, %v196_v17, 0.0  ;;  %v156_v23 = vmul.f32 %v785_v6, %v988_v16  ;;  %v168_v26 = vsel %vm158_vm1, %v157_v24, 0.0 }
  0xd8   :  { %198 = vadd.xlane.f32.xlu0 %v197_v18 }
  0xd9   :  { %160 = vadd.xlane.f32.xlu1 %v159_v20  ;;  %v203_v21 = vsel %vm158_vm1, %v195_v19, 0.0  ;;  %v165_v25 = vsel %vm158_vm1, %v156_v23, 0.0 }
  0xdc   :  { %204 = vadd.xlane.f32.xlu0 %v203_v21 }
  0xdd   :  { %207 = vadd.xlane.f32.xlu1 %v206_v22 }
  0xe0   :  { %166 = vadd.xlane.f32.xlu0 %v165_v25 }
  0xe1   :  { %169 = vadd.xlane.f32.xlu1 %v168_v26 }
  0xf2   :  { %219 = vbcast.lane.b32.xlu1 %v788_v27, 264 }
  0xf6   :  { %215 = vbcast.lane.b32.xlu0 %v788_v27, 256  ;;  %177 = vbcast.lane.b32.xlu1 %v786_v29, 256 }
  0xfa   :  { %181 = vbcast.lane.b32.xlu1 %v786_v29, 264 }
 0x15d   :  { %v202_v30 = vpop.xlane.xlu0 %201 }
 0x15e   :  { %v164_v31 = vpop.xlane.xlu1 %163 }
 0x161   :  { %v199_v32 = vpop.xlane.xlu0 %198 }
 0x162   :  { %v161_v33 = vpop.xlane.xlu1 %160 }
 0x165   :  { %v205_v35 = vpop.xlane.xlu0 %204 }
 0x166   :  { %v208_v34 = vpop.xlane.xlu1 %207 }
 0x169   :  { %v167_v37 = vpop.xlane.xlu0 %166 }
 0x16a   :  { %v170_v36 = vpop.xlane.xlu1 %169 }
 0x16d   :  { %v216_v42 = vpop.permute.xlu0 %215 }
 0x16e   :  { %v220_v38 = vpop.permute.xlu1 %219  ;;  %v225_v44 = vadd.f32 %v216_v42, %v205_v35  ;;  %v223_v46 = vadd.f32 %v216_v42, %v199_v32 }
 0x16f   :  { %v224_v39 = vadd.f32 %v220_v38, %v202_v30  ;;  %v226_v48 = vadd.f32 %v220_v38, %v208_v34 }
 0x171   :  { %255 = vperm.xlu1 %859, %v224_v39  }
 0x172   :  { %v178_v40 = vpop.permute.xlu1 %177 }
 0x173   :  { %v185_v41 = vadd.f32 %v178_v40, %v161_v33  ;;  %v187_v47 = vadd.f32 %v178_v40, %v167_v37 }
 0x175   :  { %229 = vperm.xlu1 %859, %v185_v41  }
 0x176   :  { %v182_v43 = vpop.permute.xlu1 %181 }
 0x177   :  { %v186_v45 = vadd.f32 %v182_v43, %v164_v31  ;;  %v188_v49 = vadd.f32 %v182_v43, %v170_v36 }
 0x179   :  { %258 = vperm.xlu1 %859, %v225_v44   ;;  %234 = vperm.xlu0 %860, %v186_v45  }
 0x17d   :  { %239 = vperm.xlu1 %859, %v187_v47   ;;  %252 = vperm.xlu0 %860, %v223_v46  }
 0x181   :  { %261 = vperm.xlu0 %860, %v226_v48  }
 0x185   :  { %244 = vperm.xlu0 %860, %v188_v49  }
 0x1ec   :  { %v256_v52 = vpop.permute.xlu1 %255 }
 0x1ed   :  { %v273_v60 = vrot.slane %v256_v52, %v272_v57 }
 0x1f0   :  { %v230_v55 = vpop.permute.xlu1 %229 }
 0x1f4   :  { %v235_v56 = vpop.permute.xlu0 %234  ;;  %v259_v61 = vpop.permute.xlu1 %258 }
 0x1f5   :  { %v279_v3 = vrot.slane %v259_v61, %v267_v58 }
 0x1f8   :  { %v253_v59 = vpop.permute.xlu0 %252  ;;  %v240_v7 = vpop.permute.xlu1 %239 }
 0x1f9   :  { %v268_v62 = vrot.slane %v253_v59, %v267_v58 }
 0x1fb   :  { %v275_v63 = vsel %vm274_vm2, %v273_v60, %v268_v62 }
 0x1fc   :  { %v262_v0 = vpop.permute.xlu0 %261  ;;  %v306_v1 = vadd.f32 %v275_v63, %v235_v56  ;;  %v305_v2 = vadd.f32 %v275_v63, %v230_v55  ;;  %v927_v63 = vmov 0.0  }
 0x1fd   :  { %v283_v4 = vrot.slane %v262_v0, %v272_v57  ;;  %843 = vmatprep.subr.mxu0 %v927_v63  ;;  %851 = vmatprep.mubr.msk.f32.mxu0 %vm928_vm4, %v927_v63  ;;  %v793_v0 = vld [vmem:[#allocation2 + $0x2] ss:$0 sm:$0xff] }
 0x1fe   :  { %v310_v5 = vmul.f32 0.2, %v306_v1  ;;  %v309_v6 = vmul.f32 0.2, %v305_v2 }
 0x1ff   :  { %v284_v8 = vsel %vm274_vm2, %v283_v4, %v279_v3 }
 0x200   :  { %v245_v11 = vpop.permute.xlu0 %244  ;;  %v307_v12 = vadd.f32 %v284_v8, %v240_v7  ;;  %v314_v13 = vmax.f32 %v306_v1, %v310_v5  ;;  %v313_v15 = vmax.f32 %v305_v2, %v309_v6 }
 0x201   :  { %v308_v17 = vadd.f32 %v284_v8, %v245_v11 }
 0x202   :  { %v311_v18 = vmul.f32 0.2, %v307_v12  ;;  %v320_v19 = vadd.f32 %v318_v9, %v314_v13  ;;  %v319_v20 = vadd.f32 %v317_v10, %v313_v15 }
 0x203   :  { %v312_v21 = vmul.f32 0.2, %v308_v17 }
 0x204   :  { %v327_v22 = vsel %vm323_vm3, %v320_v19, -inf  ;;  %v324_v23 = vsel %vm323_vm3, %v319_v20, -inf  ;;  %v315_v24 = vmax.f32 %v307_v12, %v311_v18 }
 0x205   :  { %v316_v25 = vmax.f32 %v308_v17, %v312_v21  ;;  %328 = vmax.xlane.f32.xlu0 %v327_v22  ;;  %325 = vmax.xlane.f32.xlu1 %v324_v23 }
 0x206   :  { %v321_v26 = vadd.f32 %v317_v10, %v315_v24 }
 0x207   :  { %v322_v28 = vadd.f32 %v318_v9, %v316_v25 }
 0x208   :  { %v330_v27 = vsel %vm323_vm3, %v321_v26, -inf }
 0x209   :  { %331 = vmax.xlane.f32.xlu0 %v330_v27  ;;  %v333_v29 = vsel %vm323_vm3, %v322_v28, -inf }
 0x20d   :  { %334 = vmax.xlane.f32.xlu0 %v333_v29 }
 0x28e   :  { %v329_v30 = vpop.xlane.xlu0 %328  ;;  %v326_v31 = vpop.xlane.xlu1 %325 }
 0x28f   :  { %v337_v32 = vsub.f32 %v320_v19, %v329_v30  ;;  %v336_v33 = vsub.f32 %v319_v20, %v326_v31 }
 0x291   :  { %v342_v34 = vmul.f32 1.442695, %v337_v32  ;;  %v340_v35 = vmul.f32 1.442695, %v336_v33 }
 0x292   :  { %v332_v36 = vpop.xlane.xlu0 %331 }
 0x293   :  { %861 = vpow2.f32 %v342_v34  ;;  %v338_v37 = vsub.f32 %v321_v26, %v332_v36 }
 0x294   :  { %863 = vpow2.f32 %v340_v35 }
 0x295   :  { %v344_v38 = vmul.f32 1.442695, %v338_v37 }
 0x296   :  { %v335_v39 = vpop.xlane.xlu0 %334 }
 0x297   :  { %865 = vpow2.f32 %v344_v38  ;;  %v339_v40 = vsub.f32 %v322_v28, %v335_v39 }
 0x299   :  { %v346_v41 = vmul.f32 1.442695, %v339_v40 }
 0x29b   :  { %867 = vpow2.f32 %v346_v41 }
 0x2a0   :  { %v862_v42 = vpop.eup %861 }
 0x2a1   :  { %v864_v43 = vpop.eup %863  ;;  %v351_v44 = vsel %vm323_vm3, %v862_v42, 0.0 }
 0x2a2   :  { %352 = vadd.xlane.f32.xlu0 %v351_v44  ;;  %v348_v45 = vsel %vm323_vm3, %v864_v43, 0.0 }
 0x2a3   :  { %349 = vadd.xlane.f32.xlu1 %v348_v45 }
 0x2a4   :  { %v866_v46 = vpop.eup %865 }
 0x2a5   :  { %v354_v47 = vsel %vm323_vm3, %v866_v46, 0.0 }
 0x2a7   :  { %355 = vadd.xlane.f32.xlu1 %v354_v47 }
 0x2a8   :  { %v868_v48 = vpop.eup %867 }
 0x2a9   :  { %v357_v49 = vsel %vm323_vm3, %v868_v48, 0.0 }
 0x2aa   :  { %358 = vadd.xlane.f32.xlu0 %v357_v49 }
 0x2b8   :  { %676 = vperm.xlu1 %859, %v46_v50   ;;  %v794_v50 = vld [vmem:[#allocation2 + $0x3] ss:$0 sm:$0xff] }
 0x32b   :  { %v353_v51 = vpop.xlane.xlu0 %352 }
 0x32c   :  { %869 = vrcp.f32 %v353_v51  ;;  %v350_v52 = vpop.xlane.xlu1 %349 }
 0x32d   :  { %871 = vrcp.f32 %v350_v52 }
 0x330   :  { %v356_v53 = vpop.xlane.xlu1 %355 }
 0x331   :  { %873 = vrcp.f32 %v356_v53 }
 0x333   :  { %v359_v54 = vpop.xlane.xlu0 %358 }
 0x334   :  { %875 = vrcp.f32 %v359_v54 }
 0x339   :  { %v870_v55 = vpop.eup %869 }
 0x33a   :  { %v872_v56 = vpop.eup %871  ;;  %v365_v57 = vmul.f32 %v870_v55, %v862_v42  ;;  %v795_v55 = vld [vmem:[#allocation2 + $0x4] ss:$0 sm:$0xff] }
 0x33b   :  { %v364_v58 = vmul.f32 %v872_v56, %v864_v43 }
 0x33d   :  { %833 = vmatprep.mubr.msk.f32.mxu1 %vm323_vm3, %v364_v58 }
 0x33e   :  { %v874_v59 = vpop.eup %873  ;;  %834 = vmatmul.mubr.msk.f32.vlgmr.msra.gmra.mxu1 %vm323_vm3, %v365_v57 }
 0x33f   :  { %837 = vmatpush3.msra.mxu1 %v985_v14  ;;  %v366_v60 = vmul.f32 %v874_v59, %v866_v46 }
 0x340   :  { %838 = vmatprep.subr.mxu1 %v988_v16 }
 0x341   :  { %v876_v61 = vpop.eup %875  ;;  %839 = vmatpush3.msra.mxu1 %v988_v16  ;;  %840 = vmatprep.mubr.msk.f32.mxu1 %vm323_vm3, %v366_v60 }
 0x342   :  { %v367_v62 = vmul.f32 %v876_v61, %v868_v48 }
 0x344   :  { %841 = vmatmul.mubr.msk.f32.vlgmr.msra.gmra.mxu1 %vm323_vm3, %v367_v62 }
 0x3fe   :  { %v835_v1 = vpop.f32.mrf.mxu1 }
 0x3ff   :  { %v535_v2 = vadd.f32 %v835_v1, %v793_v0  ;;  %v603_v1 = vld [vmem:[%s1070_s5] sm:$0xff] }
 0x400   :  { %v440_v14 = vpop.f32.mrf.mxu1 }
 0x401   :  { %v534_v3 = vadd.f32 %v793_v0, %v440_v14  ;;  %v553_v6 = vmul.f32 %v535_v2, %v535_v2  ;;  %v539_v9 = vsel %vm158_vm1, %v535_v2, 0.0  ;;  %v604_v14 = vld [vmem:[%s1070_s5 + $0x8] sm:$0xff]  ;;  %s929_s5 = smov [#allocation5]  }
 0x402   :  { %s772_s21 = sshll.u32 %s929_s5, 4  ;;  %s773_s21 = int_to_ptr.vmem [resolvable:$true] %s772_s21 }
 0x403   :  { %v552_v4 = vmul.f32 %v534_v3, %v534_v3  ;;  %v538_v16 = vsel %vm158_vm1, %v534_v3, 0.0  ;;  %v557_v13 = vsel %vm158_vm1, %v553_v6, 0.0  ;;  %s901_s22 = scalar_lea.vmem %s773_s21, 16  ;;  %s905_s23 = scalar_lea.vmem %s773_s21, 32 }
 0x404   :  { %v842_v5 = vpop.f32.mrf.mxu1  ;;  %v540_v12 = vadd.f32 %v539_v9, %v538_v16  ;;  %p902_p5 = scmp.ne.s32.totalorder %s773_s21, %s901_s22  ;;  %p906_p6 = scmp.lt.s32.totalorder %s773_s21, %s773_s21 }
 0x405   :  { %v537_v7 = vadd.f32 %v842_v5, %v793_v0  ;;  %v556_v10 = vsel %vm158_vm1, %v552_v4, 0.0  ;;  %p907_p7 = scmp.lt.s32.totalorder %s905_s23, %s901_s22 }
 0x406   :  { %v521_v8 = vpop.f32.mrf.mxu1  ;;  %v558_v19 = vadd.f32 %v557_v13, %v556_v10 }
 0x407   :  { %v536_v11 = vadd.f32 %v793_v0, %v521_v8  ;;  %v555_v15 = vmul.f32 %v537_v7, %v537_v7  ;;  %v543_v21 = vsel %vm158_vm1, %v537_v7, 0.0  ;;  %p908_p8 = por %p907_p7, %p906_p6 }
 0x409   :  { %v541_v17 = vsel %vm158_vm1, %v536_v11, 0.0  ;;  %v554_v18 = vmul.f32 %v536_v11, %v536_v11  ;;  %v561_v25 = vsel %vm158_vm1, %v555_v15, 0.0  ;;  %p909_p9 = pnand %p908_p8, %p902_p5 }
 0x40a   :  { %v542_v20 = vadd.f32 %v541_v17, %v540_v12 }
 0x40b   :  { %v559_v22 = vsel %vm158_vm1, %v554_v18, 0.0 }
 0x40c   :  { %v544_v23 = vadd.f32 %v543_v21, %v542_v20  ;;  %v560_v24 = vadd.f32 %v559_v22, %v558_v19 }
 0x40e   :  { %v545_v26 = vrot.slane %v544_v23, 4  ;;  %v562_v27 = vadd.f32 %v561_v25, %v560_v24 }
 0x410   :  { %v546_v28 = vadd.f32 %v545_v26, %v544_v23  ;;  %v563_v29 = vrot.slane %v562_v27, 4 }
 0x412   :  { %v547_v30 = vrot.slane %v546_v28, 2  ;;  %v564_v31 = vadd.f32 %v563_v29, %v562_v27 }
 0x414   :  { %v548_v32 = vadd.f32 %v547_v30, %v546_v28  ;;  %v565_v33 = vrot.slane %v564_v31, 2 }
 0x416   :  { %v549_v34 = vrot.slane %v548_v32, 1  ;;  %v566_v35 = vadd.f32 %v565_v33, %v564_v31 }
 0x418   :  { %v550_v36 = vadd.f32 %v549_v34, %v548_v32  ;;  %v567_v37 = vrot.slane %v566_v35, 1 }
 0x41a   :  { %v551_v38 = vmul.f32 0.03125, %v550_v36  ;;  %v568_v39 = vadd.f32 %v567_v37, %v566_v35 }
 0x41c   :  { %v569_v40 = vmul.f32 0.03125, %v568_v39  ;;  %v570_v41 = vmul.f32 %v551_v38, %v551_v38  ;;  %v573_v45 = vsub.f32 %v534_v3, %v551_v38  ;;  %v574_v46 = vsub.f32 %v535_v2, %v551_v38 }
 0x41d   :  { %v575_v47 = vsub.f32 %v536_v11, %v551_v38  ;;  %v576_v48 = vsub.f32 %v537_v7, %v551_v38 }
 0x41e   :  { %v571_v42 = vsub.f32 %v569_v40, %v570_v41 }
 0x420   :  { %v572_v43 = vmax.f32 %v571_v42, 0.0 }
 0x422   :  { %v577_v44 = vadd.f32 1e-05, %v572_v43 }
 0x424   :  { %877 = vrsqrt.f32 %v577_v44 }
 0x431   :  { %v878_v49 = vpop.eup %877 }
 0x432   :  { %v579_v51 = vmul.f32 %v878_v49, %v573_v45  ;;  %v580_v52 = vmul.f32 %v878_v49, %v574_v46  ;;  %v581_v53 = vmul.f32 %v878_v49, %v575_v47  ;;  %v582_v54 = vmul.f32 %v878_v49, %v576_v48 }
 0x434   :  { %v587_v56 = vmul.f32 %v794_v50, %v579_v51  ;;  %v588_v57 = vmul.f32 %v794_v50, %v580_v52  ;;  %v589_v58 = vmul.f32 %v794_v50, %v581_v53  ;;  %v590_v59 = vmul.f32 %v794_v50, %v582_v54  ;;  %v796_v50 = vld [vmem:[#allocation2 + $0x5] ss:$0 sm:$0xff]  ;;  %v797_v54 = vld [vmem:[#allocation2 + $0x6] ss:$0 sm:$0xff] }
 0x436   :  { %v595_v60 = vadd.f32 %v795_v55, %v587_v56  ;;  %v596_v61 = vadd.f32 %v795_v55, %v588_v57  ;;  %v597_v62 = vadd.f32 %v795_v55, %v589_v58  ;;  %v598_v0 = vadd.f32 %v795_v55, %v590_v59 }
 0x438   :  { %v599_v2 = vmax.f32 %v595_v60, 0.0  ;;  %v601_v3 = vmax.f32 %v597_v62, 0.0  ;;  %v600_v4 = vmax.f32 %v596_v61, 0.0  ;;  %v602_v5 = vmax.f32 %v598_v0, 0.0 }
 0x43a   :  { %v605_v6 = vmul.f32 %v603_v1, %v599_v2  ;;  %v607_v16 = vmul.f32 %v603_v1, %v601_v3  ;;  %v606_v7 = vmul.f32 %v604_v14, %v600_v4  ;;  %v608_v8 = vmul.f32 %v604_v14, %v602_v5 }
 0x43c   :  { %v609_v9 = vsel %vm158_vm1, %v605_v6, 0.0  ;;  %v623_v10 = vmul.f32 %v605_v6, %v605_v6  ;;  %v625_v11 = vmul.f32 %v607_v16, %v607_v16  ;;  %v610_v12 = vsel %vm158_vm1, %v606_v7, 0.0 }
 0x43d   :  { %v624_v13 = vmul.f32 %v606_v7, %v606_v7  ;;  %v611_v17 = vadd.f32 %v610_v12, %v609_v9  ;;  %v612_v18 = vsel %vm158_vm1, %v607_v16, 0.0  ;;  %v626_v19 = vmul.f32 %v608_v8, %v608_v8 }
 0x43e   :  { %v627_v15 = vsel %vm158_vm1, %v623_v10, 0.0  ;;  %v630_v23 = vsel %vm158_vm1, %v625_v11, 0.0  ;;  %v614_v24 = vsel %vm158_vm1, %v608_v8, 0.0 }
 0x43f   :  { %v628_v20 = vsel %vm158_vm1, %v624_v13, 0.0  ;;  %v613_v21 = vadd.f32 %v612_v18, %v611_v17  ;;  %v632_v27 = vsel %vm158_vm1, %v626_v19, 0.0 }
 0x440   :  { %v629_v22 = vadd.f32 %v628_v20, %v627_v15 }
 0x441   :  { %v615_v25 = vadd.f32 %v614_v24, %v613_v21 }
 0x442   :  { %v631_v26 = vadd.f32 %v630_v23, %v629_v22 }
 0x443   :  { %v616_v28 = vrot.slane %v615_v25, 4 }
 0x444   :  { %v633_v29 = vadd.f32 %v632_v27, %v631_v26 }
 0x445   :  { %v617_v30 = vadd.f32 %v616_v28, %v615_v25 }
 0x446   :  { %v634_v31 = vrot.slane %v633_v29, 4 }
 0x447   :  { %v618_v32 = vrot.slane %v617_v30, 2 }
 0x448   :  { %v635_v33 = vadd.f32 %v634_v31, %v633_v29 }
 0x449   :  { %v619_v34 = vadd.f32 %v618_v32, %v617_v30 }
 0x44a   :  { %v636_v35 = vrot.slane %v635_v33, 2 }
 0x44b   :  { %v620_v36 = vrot.slane %v619_v34, 1 }
 0x44c   :  { %v637_v37 = vadd.f32 %v636_v35, %v635_v33 }
 0x44d   :  { %v621_v38 = vadd.f32 %v620_v36, %v619_v34 }
 0x44e   :  { %v638_v39 = vrot.slane %v637_v37, 1 }
 0x44f   :  { %v622_v40 = vmul.f32 0.03125, %v621_v38 }
 0x450   :  { %v639_v41 = vadd.f32 %v638_v39, %v637_v37 }
 0x451   :  { %v641_v43 = vmul.f32 %v622_v40, %v622_v40  ;;  %v647_v47 = vsub.f32 %v608_v8, %v622_v40  ;;  %v646_v48 = vsub.f32 %v607_v16, %v622_v40  ;;  %v645_v53 = vsub.f32 %v606_v7, %v622_v40  ;;  %v677_v16 = vpop.permute.xlu1 %676 }
 0x452   :  { %v640_v42 = vmul.f32 0.03125, %v639_v41  ;;  %v644_v59 = vsub.f32 %v605_v6, %v622_v40  ;;  %v43_v6 = vld [vmem:[#allocation2 + $0x7] sm:$0x1] }
 0x454   :  { %v642_v44 = vsub.f32 %v640_v42, %v641_v43 }
 0x456   :  { %v643_v45 = vmax.f32 %v642_v44, 0.0 }
 0x458   :  { %v648_v46 = vadd.f32 1e-05, %v643_v45 }
 0x45a   :  { %879 = vrsqrt.f32 %v648_v46 }
 0x467   :  { %v880_v49 = vpop.eup %879 }
 0x468   :  { %v653_v51 = vmul.f32 %v880_v49, %v647_v47  ;;  %v652_v52 = vmul.f32 %v880_v49, %v646_v48  ;;  %v651_v57 = vmul.f32 %v880_v49, %v645_v53  ;;  %v650_v0 = vmul.f32 %v880_v49, %v644_v59 }
 0x46a   :  { %v661_v55 = vmul.f32 %v796_v50, %v653_v51  ;;  %v660_v56 = vmul.f32 %v796_v50, %v652_v52  ;;  %v659_v62 = vmul.f32 %v796_v50, %v651_v57  ;;  %v658_v2 = vmul.f32 %v796_v50, %v650_v0 }
 0x46c   :  { %v669_v58 = vadd.f32 %v797_v54, %v661_v55  ;;  %v668_v61 = vadd.f32 %v797_v54, %v660_v56  ;;  %v667_v14 = vadd.f32 %v797_v54, %v659_v62  ;;  %v666_v4 = vadd.f32 %v797_v54, %v658_v2 }
 0x46e   :  { %v673_v60 = vmax.f32 %v669_v58, 0.0  ;;  %v672_v1 = vmax.f32 %v668_v61, 0.0  ;;  %v671_v3 = vmax.f32 %v667_v14, 0.0  ;;  %v670_v5 = vmax.f32 %v666_v4, 0.0 }
 0x470   :  { %844 = vmatpush3.xpose.msk.msra.mxu0 %vm158_vm1, %v673_v60 }
 0x471   :  { %845 = vmatprep.subr.mxu0 %v927_v63 }
 0x474   :  { %846 = vmatpush3.xpose.msk.msra.mxu0 %vm158_vm1, %v672_v1 }
 0x475   :  { %847 = vmatprep.subr.mxu0 %v927_v63 }
 0x478   :  { %848 = vmatpush3.xpose.msk.msra.mxu0 %vm158_vm1, %v671_v3 }
 0x479   :  { %849 = vmatprep.subr.mxu0 %v927_v63 }
 0x47c   :  { %850 = vmatpush3.xpose.msk.msra.mxu0 %vm158_vm1, %v670_v5 }
 0x47f   :  { %852 = vmatmul.mubr.msk.f32.vlgmr.msra.gmra.mxu0 %vm158_vm1, %v43_v6 }
 0x53f   :  { %v760_v7 = vpop.f32.mrf.mxu0 }
 0x540   :  { %v761_v8 = vadd.f32 %v760_v7, %v677_v16 }
 0x541   :  { %v853_v9 = vpop.f32.mrf.mxu0 }
 0x542   :  { %765 = vst.msk [vmem:[#allocation5] sm:$0x1] %vm764_vm5, %v761_v8 }
 0x543   :  { %912 = shalt.err (!%p909_p9)
}
 0x544   :  { %775 = dma.vmem_to_hbm [thread:$0]  %s773_s21, 16, %s1071_s6, [#allocation4]  }
 0x545   :  { %923 = dma.done.wait [#allocation4], 16  }
 0x546   :  { %924 = vsyncadd [#allocation4], 4294967280 }
 0x547   :  { %779 = vsyncpa [#allocation3], 1 }
 0x548   :  { %780 = vsyncpa [#allocation4], 1 }

</bundles_post_ra>
